<compile_context>
chip_gen: v7x
topology: tpu7x:2x2x1
jax: 0.10.0
libtpu: 0.0.40
codegen_flags: <defaults>
</compile_context>

<pallas_src>
import jax
import jax.numpy as jnp
from jax.experimental import pallas as pl
from jax.experimental.pallas import tpu as pltpu


def _add_pos_enc_kernel(x_ref, add_ref, o_ref):
    # x_ref: (tm, D), add_ref: (tm, 1), o_ref: (tm, D); all in x.dtype.
    # (tm, 1) broadcasts across lanes on the VPU; the kernel is HBM-bound.
    o_ref[...] = x_ref[...] + add_ref[...]


def _round_up(n, m):
    return ((n + m - 1) // m) * m


_DEFAULT_BLOCK_BYTES = 4 * 1024 * 1024  # >=85% of roofline on v5e/v6e.


def _target_block_bytes():
    # v7x: 64 MiB VMEM per TC but ~3.2 TB/s HBM -> bigger blocks pay off.
    # v5e/v6e (128 MiB VMEM): 4 MiB blocks are already near roofline.
    try:
        info = pltpu.get_tpu_info()
        if info.vmem_capacity_bytes <= 64 * 1024 * 1024:
            return 6 * 1024 * 1024
    except Exception:
        pass
    return _DEFAULT_BLOCK_BYTES


def _choose_row_tile(n_rows, d, itemsize, target_bytes):
    tm = (target_bytes // max(1, d * itemsize)) // 8 * 8
    tm = max(8, tm)
    tm = min(tm, _round_up(n_rows, 8))
    return tm


def add_positional_encoding(x, mask, timing_table, *, block_rows=None, donate_x=False):
    """Eval-mode forward of AddPositionalEncoding.

    x: (B, S, D), mask: (B, S) bool, timing_table: (max_len,)
    Returns where(mask == False, x + timing_table[:S][None, :, None], x).
    `donate_x=True` aliases the output onto x's buffer (caller must donate x).
    """
    B, S, D = x.shape
    assert mask.shape == (B, S)
    # Mirrors the module's `assert seq_length < self.max_len`.
    assert S < timing_table.shape[0]

    # Fuse mask + timing into one additive scalar per (batch, position).
    # NOTE: for bf16 x the add happens in bf16 (PyTorch would promote to f32);
    # acceptable by design, documented here.
    timing = timing_table[:S].astype(x.dtype)
    add = jnp.where(mask, jnp.zeros((), x.dtype), timing[None, :]).astype(x.dtype)

    # Flatten (B, S) -> N rows; metadata-only for contiguous arrays.
    N = B * S
    x_flat = x.reshape(N, D)
    add_col = add.reshape(N, 1)

    itemsize = x.dtype.itemsize
    if block_rows is None:
        tm = _choose_row_tile(N, D, itemsize, _target_block_bytes())
    else:
        tm = max(8, (block_rows // 8) * 8)
    n_blocks = pl.cdiv(N, tm)

    # VMEM budget: double-buffered x + out blocks plus the lane-padded add
    # column tile (bounded with 4 B/elem), plus headroom.
    x_block_bytes = tm * D * itemsize
    add_block_bytes = tm * 128 * 4
    vmem_limit = int(min(
        56 * 1024 * 1024,
        max(32 * 1024 * 1024,
            2 * (2 * x_block_bytes + add_block_bytes) + 4 * 1024 * 1024)))

    out = pl.pallas_call(
        _add_pos_enc_kernel,
        out_shape=jax.ShapeDtypeStruct((N, D), x.dtype),
        grid_spec=pltpu.PrefetchScalarGridSpec(
            num_scalar_prefetch=0,
            grid=(n_blocks,),
            in_specs=[
                pl.BlockSpec((tm, D), lambda i: (i, 0)),
                pl.BlockSpec((tm, 1), lambda i: (i, 0)),
            ],
            out_specs=pl.BlockSpec((tm, D), lambda i: (i, 0)),
        ),
        compiler_params=pltpu.CompilerParams(
            dimension_semantics=("parallel",),
            vmem_limit_bytes=vmem_limit,
        ),
        input_output_aliases={0: 0} if donate_x else {},
    )(x_flat, add_col)

    return out.reshape(B, S, D)


def _reference(x, mask, timing_table):
    S = x.shape[1]
    timing = timing_table[:S].astype(x.dtype)[None, :, None]
    return jnp.where(~mask[:, :, None], x + timing, x)


if __name__ == "__main__":
    key = jax.random.PRNGKey(0)
    ks = jax.random.split(key, 7)

    MAX_LEN = 2048
    # nn.init.normal_(timing_table) -> deterministic normal init here.
    timing_table = jax.random.normal(ks[0], (MAX_LEN,), dtype=jnp.float32)

    # Case 1: module-default d_model=256, small shapes, N = B*S multiple of 8.
    B, S, D = 2, 8, 256
    x = jax.random.normal(ks[1], (B, S, D), dtype=jnp.float32)
    mask = jax.random.bernoulli(ks[2], p=0.5, shape=(B, S))
    out = jax.block_until_ready(add_positional_encoding(x, mask, timing_table))
    ref = _reference(x, mask, timing_table)
    assert out.shape == (B, S, D)
    assert jnp.allclose(out, ref, atol=1e-6), "mismatch vs reference (case 1)"

    # Case 2: B*S = 15 not a multiple of 8 -> single ragged (masked) block.
    B2, S2, D2 = 3, 5, 256
    x2 = jax.random.normal(ks[3], (B2, S2, D2), dtype=jnp.float32)
    mask2 = jax.random.bernoulli(ks[4], p=0.5, shape=(B2, S2))
    out2 = jax.block_until_ready(add_positional_encoding(x2, mask2, timing_table))
    ref2 = _reference(x2, mask2, timing_table)
    assert out2.shape == (B2, S2, D2)
    assert jnp.allclose(out2, ref2, atol=1e-6), "mismatch vs reference (case 2)"

    # Case 3: forced small tile -> multi-block grid with ragged final block,
    # and the output aliased onto x's buffer (donate_x path).
    B3, S3, D3 = 2, 10, 256
    x3 = jax.random.normal(ks[5], (B3, S3, D3), dtype=jnp.float32)
    mask3 = jax.random.bernoulli(ks[6], p=0.5, shape=(B3, S3))
    ref3 = _reference(x3, mask3, timing_table)
    out3 = jax.block_until_ready(
        add_positional_encoding(x3, mask3, timing_table, block_rows=8, donate_x=True))
    assert out3.shape == (B3, S3, D3)
    assert jnp.allclose(out3, ref3, atol=1e-6), "mismatch vs reference (case 3)"

    print("KERNEL_OK")
</pallas_src>

<mosaic_0001>
module attributes {stable_mosaic.version = 11 : i64} {
  func.func @_add_pos_enc_kernel(%arg0: i32, %arg1: memref<16x256xf32, #tpu.memory_space<vmem>>, %arg2: memref<16x1xf32, #tpu.memory_space<vmem>>, %arg3: memref<16x256xf32, #tpu.memory_space<vmem>>) attributes {dimension_semantics = [#tpu.dimension_semantics<parallel>], iteration_bounds = array<i64: 1>, scalar_prefetch = 0 : i64, scratch_operands = 0 : i64, tpu.core_type = #tpu.core_type<tc>, window_params = [{transform_indices = @transform_0, window_bounds = array<i64: 16, 256>}, {transform_indices = @transform_1, window_bounds = array<i64: 16, 1>}, {transform_indices = @transform_2, window_bounds = array<i64: 16, 256>}]} {
    %c0 = arith.constant 0 : index
    %c0_0 = arith.constant 0 : index
    %0 = vector.load %arg1[%c0, %c0_0] : memref<16x256xf32, #tpu.memory_space<vmem>>, vector<16x256xf32>
    %c0_1 = arith.constant 0 : index
    %c0_2 = arith.constant 0 : index
    %1 = vector.load %arg2[%c0_1, %c0_2] : memref<16x1xf32, #tpu.memory_space<vmem>>, vector<16x1xf32>
    %2 = vector.broadcast %1 : vector<16x1xf32> to vector<16x256xf32>
    %3 = arith.addf %0, %2 : vector<16x256xf32>
    %c0_3 = arith.constant 0 : index
    %c0_4 = arith.constant 0 : index
    %4 = vector.load %arg3[%c0_3, %c0_4] : memref<16x256xf32, #tpu.memory_space<vmem>>, vector<16x256xf32>
    tpu.vector_store %arg3[%c0_3, %c0_4], %3 {strides = array<i32>} : memref<16x256xf32, #tpu.memory_space<vmem>>, vector<16x256xf32>,
    return
  }
  func.func @transform_0(%arg0: i32) -> (i32, i32) {
    %c0_i32 = arith.constant 0 : i32
    %c0_i32_0 = arith.constant 0 : i32
    return %arg0, %c0_i32 : i32, i32
  }
  func.func @transform_1(%arg0: i32) -> (i32, i32) {
    %c0_i32 = arith.constant 0 : i32
    %c0_i32_0 = arith.constant 0 : i32
    return %arg0, %c0_i32 : i32, i32
  }
  func.func @transform_2(%arg0: i32) -> (i32, i32) {
    %c0_i32 = arith.constant 0 : i32
    %c0_i32_0 = arith.constant 0 : i32
    return %arg0, %c0_i32 : i32, i32
  }
}

</mosaic_0001>

<bundles_post_ra>
// kernel: tpu_custom_call.1
= control target key start
LH: loop header
LB: loop body
LE: loop exit
PB: predicated region body
PF: predicated region fallthrough
CT: control target
= control target key end

     0   :  { %7 = vsyncpa [#allocation3], 0  ;;  %s177_s0 = inlined_call_operand.hbm [shape: f32[16,256], index: 0, kind: input, shape index: {}]   ;;  %s178_s1 = inlined_call_operand.vmem [shape: f32[16,1], index: 1, kind: input, shape index: {}]   ;;  %s179_s2 = inlined_call_operand.hbm [shape: f32[16,256], index: 2, kind: output, shape index: {}]  }
   0x1   :  { %8 = vsyncpa [#allocation4], 0  ;;  %s121_s9 = smov [#allocation2]   ;;  %s73_s13 = scalar_lea.hbm %s177_s0, 512 }
   0x2   :  { %s14_s10 = sshll.u32 %s121_s9, 4  ;;  %p74_p0 = scmp.ne.s32.totalorder %s177_s0, %s73_s13  ;;  %s15_s10 = int_to_ptr.vmem [resolvable:$true] %s14_s10 }
   0x3   :  { %p77_p1 = scmp.lt.u32.totalorder %s73_s13, %s177_s0 }
   0x5   :  { %p79_p2 = pnand %p77_p1, %p74_p0 }
   0x7   :  { %82 = shalt.err (!%p79_p2)
}
   0x8   :  { %s83_s18 = scalar_lea.vmem %s15_s10, 512  ;;  %p88_p4 = scmp.lt.s32.totalorder %s15_s10, %s15_s10 }
   0x9   :  { %p84_p3 = scmp.ne.s32.totalorder %s15_s10, %s83_s18  ;;  %p89_p5 = scmp.lt.s32.totalorder %s83_s18, %s83_s18 }
   0xb   :  { %p90_p6 = por %p89_p5, %p88_p4 }
   0xd   :  { %p91_p7 = pnand %p90_p6, %p84_p3 }
   0xf   :  { %94 = shalt.err (!%p91_p7)
}
  0x10   :  { %s122_s19 = smov 256   ;;  %s123_s20 = smov 16  }
  0x11   :  { %20 = dma.hbm_to_vmem [thread:$0]  %s177_s0, 512, %s15_s10, [#allocation3], %s122_s19, %s122_s19, %s123_s20  }
  0x12   :  { %117 = dma.done.wait [#allocation3], 512  }
  0x13   :  { %118 = vsyncadd [#allocation3], 4294966784  ;;  %v124_v0 = vmov 0   ;;  %v30_v1 = vld [vmem:[%s178_s1] sm:$0xff]  ;;  %v31_v2 = vld [vmem:[%s178_s1 + $0x8] sm:$0xff]  ;;  %s125_s0 = smov [#allocation5]  }
  0x14   :  { %72 = vset.pattern.permute.xlu0 %v124_v0  ;;  %v26_v3 = vld [vmem:[#allocation2] sm:$0xff]  ;;  %v27_v4 = vld [vmem:[#allocation2 + $0x8] sm:$0xff]  ;;  %v28_v8 = vld [vmem:[#allocation2 + $0x10] sm:$0xff]  ;;  %s55_s27 = sshll.u32 %s125_s0, 4  ;;  %s56_s27 = int_to_ptr.vmem [resolvable:$true] %s55_s27 }
  0x15   :  { %34 = vperm.xlu0 %72, %v30_v1   ;;  %v29_v9 = vld [vmem:[#allocation2 + $0x18] sm:$0xff]  ;;  %s95_s28 = scalar_lea.vmem %s56_s27, 512  ;;  %p100_p9 = scmp.lt.s32.totalorder %s56_s27, %s56_s27 }
  0x16   :  { %p96_p8 = scmp.ne.s32.totalorder %s56_s27, %s95_s28  ;;  %p101_p10 = scmp.lt.s32.totalorder %s95_s28, %s95_s28 }
  0x18   :  { %p102_p11 = por %p101_p10, %p100_p9 }
  0x19   :  { %39 = vperm.xlu0 %72, %v31_v2  }
  0x1a   :  { %p103_p12 = pnand %p102_p11, %p96_p8 }
  0x94   :  { %v35_v5 = vpop.permute.xlu0 %34 }
  0x95   :  { %v42_v6 = vadd.f32 %v35_v5, %v26_v3  ;;  %v43_v7 = vadd.f32 %v35_v5, %v27_v4 }
  0x97   :  { %46 = vst [vmem:[#allocation5] sm:$0xff] %v42_v6  ;;  %47 = vst [vmem:[#allocation5 + $0x8] sm:$0xff] %v43_v7 }
  0x98   :  { %v40_v10 = vpop.permute.xlu0 %39 }
  0x99   :  { %v44_v11 = vadd.f32 %v40_v10, %v28_v8  ;;  %v45_v12 = vadd.f32 %v40_v10, %v29_v9 }
  0x9b   :  { %48 = vst [vmem:[#allocation5 + $0x10] sm:$0xff] %v44_v11  ;;  %49 = vst [vmem:[#allocation5 + $0x18] sm:$0xff] %v45_v12 }
  0x9c   :  { %106 = shalt.err (!%p103_p12)
}
  0x9d   :  { %s107_s30 = scalar_lea.hbm %s179_s2, 512 }
  0x9e   :  { %p108_p13 = scmp.ne.s32.totalorder %s179_s2, %s107_s30  ;;  %p111_p0 = scmp.lt.u32.totalorder %s107_s30, %s179_s2 }
  0xa0   :  { %p113_p1 = pnand %p111_p0, %p108_p13 }
  0xa2   :  { %116 = shalt.err (!%p113_p1)
}
  0xa3   :  { %61 = dma.vmem_to_hbm [thread:$0]  %s56_s27, 512, %s179_s2, [#allocation4], %s122_s19, %s122_s19, %s123_s20  }
  0xa4   :  { %119 = dma.done.wait [#allocation4], 512  }
  0xa5   :  { %120 = vsyncadd [#allocation4], 4294966784 }
  0xa6   :  { %65 = vsyncpa [#allocation3], 1 }
  0xa7   :  { %66 = vsyncpa [#allocation4], 1 }

</bundles_post_ra>
